<compile_context>
chip_gen: v7x
topology: tpu7x:2x2x1
jax: 0.10.0
libtpu: 0.0.40
codegen_flags: <defaults>
</compile_context>

<pallas_src>
import functools

import jax
import jax.numpy as jnp
from jax import lax
from jax.experimental import pallas as pl
from jax.experimental.pallas import tpu as pltpu


def _round_up(v: int, m: int) -> int:
    return ((v + m - 1) // m) * m


def _sublane_multiple(dtype) -> int:
    # Sub-32-bit dtypes pack along sublanes: 8 rows/vreg for 4-byte, 16 for
    # 2-byte (bf16), 32 for 1-byte (int8/fp8).
    return max(8, 32 // jnp.dtype(dtype).itemsize)


def _vmem_limits() -> tuple[int, int]:
    """(scoped vmem_limit_bytes, input-tile sizing budget), generation-aware."""
    cap = 128 << 20
    try:
        cap = int(pltpu.get_tpu_info().vmem_capacity_bytes)
    except Exception:
        pass
    try:
        if "v7" in jax.devices()[0].device_kind.lower():
            cap = min(cap, 64 << 20)          # v7x: 64 MiB per TensorCore
    except Exception:
        pass
    limit = min((cap * 3) // 4, 100 << 20)    # ~48 MiB on v7x, ~96 MiB on v5e/v6e
    budget = limit // 2                       # conservative tile-sizing budget
    return limit, budget


def _default_exp_bf16(x_dtype) -> bool:
    # bf16 exp halves EUP work; only beneficial/safe on v6e/v7x-class chips and
    # only when the input is already bf16 (so we never degrade f32 inputs).
    if jnp.dtype(x_dtype) != jnp.dtype(jnp.bfloat16):
        return False
    try:
        kind = jax.devices()[0].device_kind.lower()
    except Exception:
        return False
    return not any(t in kind for t in ("v2", "v3", "v4", "v5"))


def _choose_blocks(n: int, c: int, itemsize: int, sub: int,
                   budget_bytes: int) -> tuple[int, int]:
    def max_rows(bc: int) -> int:
        # Per row of a (rows, bc) tile: 2x double-buffered input + ~5 f32
        # (rows, bc) temporaries + small per-row scratch.
        per_row = 2 * bc * itemsize + 5 * bc * 4 + 64
        return max(budget_bytes // per_row, 1)

    n_pad = _round_up(n, sub)

    block_c = c
    bn = max_rows(c)
    if c > 4096 and bn < 256:
        # Vocab-scale C: tile the class axis (online logsumexp) so row tiles
        # stay large and lane-dense.
        bc = (budget_bytes // (256 * (2 * itemsize + 16))) // 128 * 128
        bc = max(128, bc)
        if bc < c:
            block_c = bc
            bn = max_rows(block_c)

    bn = min(bn, n_pad)
    bn = max(sub, (bn // sub) * sub)
    return bn, block_c


def _ls_ce_kernel(x_ref, tgt_ref, out_ref, m_ref, l_ref, s_ref, *,
                  smoothing: float, n_total: int, c_total: int,
                  block_n: int, block_c: int, ragged_c: bool, exp_bf16: bool):
    """One (TN, TC) tile: online logsumexp + online weighted sum over classes;
    at the last class tile, writes a masked partial loss sum for this row block."""
    i = pl.program_id(0)
    k = pl.program_id(1)
    confidence = 1.0 - smoothing

    @pl.when(k == 0)
    def _init():
        m_ref[...] = jnp.full_like(m_ref, -1e30)
        l_ref[...] = jnp.zeros_like(l_ref)
        s_ref[...] = jnp.zeros_like(s_ref)

    xf = x_ref[...].astype(jnp.float32)          # per-tile upcast (HBM stays narrow)
    tn, bc = xf.shape

    col = k * block_c + lax.broadcasted_iota(jnp.int32, (tn, bc), 1)
    tgt = tgt_ref[...]                           # (TN, 1) int32

    if ragged_c:
        col_ok = col < c_total
        x_max_in = jnp.where(col_ok, xf, jnp.float32(-1e30))
        x_sum_in = jnp.where(col_ok, xf, jnp.float32(0.0))
    else:
        x_max_in = xf
        x_sum_in = xf

    # ---- online logsumexp along the class (lane) axis ----
    m_prev = m_ref[...]
    m_new = jnp.maximum(m_prev, jnp.max(x_max_in, axis=-1, keepdims=True))
    alpha = jnp.exp(m_prev - m_new)              # (TN, 1), args <= 0
    shifted = x_max_in - m_new                   # <= 0 for valid data
    if exp_bf16:
        e = jnp.exp(shifted.astype(jnp.bfloat16)).astype(jnp.float32)
    else:
        e = jnp.exp(shifted)
    l_ref[...] = alpha * l_ref[...] + jnp.sum(e, axis=-1, keepdims=True)
    m_ref[...] = m_new

    # ---- fused weighted sum: sum_j w_j * x_j, w = confidence*onehot + smoothing/C
    # (no (TN, C) weight tile is materialized)
    sum_x = jnp.sum(x_sum_in, axis=-1, keepdims=True)
    tgt_x = jnp.sum(jnp.where(col == tgt, xf, jnp.float32(0.0)),
                    axis=-1, keepdims=True)
    s_ref[...] = s_ref[...] + (jnp.float32(smoothing / c_total) * sum_x
                               + jnp.float32(confidence) * tgt_x)

    @pl.when(k == pl.num_programs(1) - 1)
    def _finalize():
        # loss_i = logsumexp_i - sum_j w_j x_ij   (weights sum to 1)
        per_row = m_ref[...] + jnp.log(l_ref[...]) - s_ref[...]
        # Mask padded rows of a ragged last batch tile.  NOTE (load-bearing):
        # padded rows may hold NaN/Inf garbage; jnp.where is a select, so the
        # garbage never reaches the sum.
        row_ids = i * block_n + lax.broadcasted_iota(jnp.int32, (tn, 1), 0)
        out_ref[0, 0] = jnp.sum(jnp.where(row_ids < n_total, per_row,
                                          jnp.float32(0.0)))


def label_smoothing_cross_entropy(x, target, smoothing: float = 0.1,
                                  block_n: int | None = None,
                                  block_c: int | None = None):
    """x: (N, C) float (any dtype; upcast per tile), target: (N,) int.

    Returns scalar float32 loss matching PyTorch LabelSmoothingCrossEntropy.
    """
    n, c = x.shape
    itemsize = jnp.dtype(x.dtype).itemsize
    sub = _sublane_multiple(x.dtype)
    vmem_limit, budget = _vmem_limits()

    auto_bn, auto_bc = _choose_blocks(n, c, itemsize, sub, budget)
    if block_n is None:
        block_n = auto_bn
    if block_c is None:
        block_c = auto_bc

    grid_n = pl.cdiv(n, block_n)
    grid_c = pl.cdiv(c, block_c)
    ragged_c = (c % block_c) != 0
    exp_bf16 = _default_exp_bf16(x.dtype)

    tgt2d = target.astype(jnp.int32).reshape(n, 1)

    cost = pl.CostEstimate(
        flops=8 * n * c,
        transcendentals=n * c + 2 * n * grid_c,
        bytes_accessed=n * c * itemsize + n * 4 + grid_n * 4,
    )

    partials = pl.pallas_call(
        functools.partial(_ls_ce_kernel, smoothing=float(smoothing),
                          n_total=n, c_total=c, block_n=block_n,
                          block_c=block_c, ragged_c=ragged_c,
                          exp_bf16=exp_bf16),
        out_shape=jax.ShapeDtypeStruct((grid_n, 1), jnp.float32),
        grid=(grid_n, grid_c),
        in_specs=[
            pl.BlockSpec((block_n, block_c), lambda i, k: (i, k)),  # x tile
            pl.BlockSpec((block_n, 1), lambda i, k: (i, 0)),        # target tile
        ],
        out_specs=pl.BlockSpec((1, 1), lambda i, k: (i, 0),
                               memory_space=pltpu.MemorySpace.SMEM),
        scratch_shapes=[pltpu.VMEM((block_n, 1), jnp.float32)] * 3,  # m, l, s
        compiler_params=pltpu.CompilerParams(
            dimension_semantics=("parallel", "arbitrary"),
            vmem_limit_bytes=vmem_limit,
        ),
        cost_estimate=cost,
    )(x, tgt2d)

    # Tiny final reduction outside the kernel; mean uses the true N.
    return jnp.sum(partials) / jnp.float32(n)


def _reference(x, target, smoothing=0.1):
    confidence = 1.0 - smoothing
    logprobs = jax.nn.log_softmax(x.astype(jnp.float32), axis=-1)
    nll = -jnp.take_along_axis(logprobs, target[:, None], axis=-1)[:, 0]
    smooth = -jnp.mean(logprobs, axis=-1)
    return jnp.mean(confidence * nll + smoothing * smooth)


if __name__ == "__main__":
    key = jax.random.PRNGKey(0)
    kx, kt = jax.random.split(key)

    # Small shapes consistent with the module: batch=8, num_classes=32, f32.
    N, C = 8, 32
    x = jax.random.normal(kx, (N, C), dtype=jnp.float32)
    target = jax.random.randint(kt, (N,), 0, C, dtype=jnp.int32)
    loss = jax.block_until_ready(label_smoothing_cross_entropy(x, target, 0.1))
    ref = _reference(x, target, 0.1)
    assert jnp.allclose(loss, ref, atol=1e-5, rtol=1e-5), (loss, ref)

    # bf16 input, auto block sizing (16-sublane rounding, single ragged row
    # block, bf16 exp on v6e/v7x); HBM copy stays narrow.
    kx2, kt2 = jax.random.split(kt)
    N2, C2 = 100, 128
    x2 = jax.random.normal(kx2, (N2, C2), dtype=jnp.bfloat16)
    t2 = jax.random.randint(kt2, (N2,), 0, C2, dtype=jnp.int32)
    loss2a = jax.block_until_ready(label_smoothing_cross_entropy(x2, t2, 0.1))
    ref2 = _reference(x2, t2, 0.1)
    assert jnp.allclose(loss2a, ref2, atol=2e-2, rtol=2e-2), (loss2a, ref2)

    # Same data, forced multi-block batch grid with a ragged last row tile
    # (exercises the per-block SMEM partials + row masking).
    loss2b = jax.block_until_ready(
        label_smoothing_cross_entropy(x2, t2, 0.1, block_n=32))
    assert jnp.allclose(loss2b, ref2, atol=2e-2, rtol=2e-2), (loss2b, ref2)

    # Class-tiled (online logsumexp) path with a ragged last class tile.
    kx3, kt3 = jax.random.split(kt2)
    N3, C3 = 24, 300
    x3 = jax.random.normal(kx3, (N3, C3), dtype=jnp.float32)
    t3 = jax.random.randint(kt3, (N3,), 0, C3, dtype=jnp.int32)
    loss3 = jax.block_until_ready(
        label_smoothing_cross_entropy(x3, t3, 0.1, block_n=8, block_c=128))
    ref3 = _reference(x3, t3, 0.1)
    assert jnp.allclose(loss3, ref3, atol=1e-4, rtol=1e-4), (loss3, ref3)

    print("KERNEL_OK")
</pallas_src>

<mosaic_0001>
module attributes {stable_mosaic.version = 11 : i64} {
  func.func @_ls_ce_kernel(%arg0: i32, %arg1: i32, %arg2: memref<8x32xf32, #tpu.memory_space<vmem>>, %arg3: memref<8x1xi32, #tpu.memory_space<vmem>>, %arg4: memref<1x1xf32, #tpu.memory_space<smem>>, %arg5: memref<8x1xf32, #tpu.memory_space<vmem>>, %arg6: memref<8x1xf32, #tpu.memory_space<vmem>>, %arg7: memref<8x1xf32, #tpu.memory_space<vmem>>) attributes {dimension_semantics = [#tpu.dimension_semantics<parallel>, #tpu.dimension_semantics<arbitrary>], iteration_bounds = array<i64: 1, 1>, scalar_prefetch = 0 : i64, scratch_operands = 3 : i64, tpu.core_type = #tpu.core_type<tc>, window_params = [{transform_indices = @transform_0, window_bounds = array<i64: 8, 32>}, {transform_indices = @transform_1, window_bounds = array<i64: 8, 1>}, {transform_indices = @transform_2, window_bounds = array<i64: 1, 1>}]} {
    %c0_i32 = arith.constant 0 : i32
    %0 = arith.cmpi eq, %arg1, %c0_i32 : i32
    %1 = arith.extui %0 : i1 to i32
    %c0_i32_0 = arith.constant 0 : i32
    %2 = arith.cmpi ne, %1, %c0_i32_0 : i32
    scf.if %2 {
      %cst_24 = arith.constant -1.000000e+30 : f32
      %44 = vector.broadcast %cst_24 : f32 to vector<8x1xf32>
      %c0_25 = arith.constant 0 : index
      %c0_26 = arith.constant 0 : index
      %45 = vector.load %arg5[%c0_25, %c0_26] : memref<8x1xf32, #tpu.memory_space<vmem>>, vector<8x1xf32>
      tpu.vector_store %arg5[%c0_25, %c0_26], %44 {strides = array<i32>} : memref<8x1xf32, #tpu.memory_space<vmem>>, vector<8x1xf32>,
      %cst_27 = arith.constant 0.000000e+00 : f32
      %46 = vector.broadcast %cst_27 : f32 to vector<8x1xf32>
      %c0_28 = arith.constant 0 : index
      %c0_29 = arith.constant 0 : index
      %47 = vector.load %arg6[%c0_28, %c0_29] : memref<8x1xf32, #tpu.memory_space<vmem>>, vector<8x1xf32>
      tpu.vector_store %arg6[%c0_28, %c0_29], %46 {strides = array<i32>} : memref<8x1xf32, #tpu.memory_space<vmem>>, vector<8x1xf32>,
      %cst_30 = arith.constant 0.000000e+00 : f32
      %48 = vector.broadcast %cst_30 : f32 to vector<8x1xf32>
      %c0_31 = arith.constant 0 : index
      %c0_32 = arith.constant 0 : index
      %49 = vector.load %arg7[%c0_31, %c0_32] : memref<8x1xf32, #tpu.memory_space<vmem>>, vector<8x1xf32>
      tpu.vector_store %arg7[%c0_31, %c0_32], %48 {strides = array<i32>} : memref<8x1xf32, #tpu.memory_space<vmem>>, vector<8x1xf32>,
    } else {
    }
    %c0 = arith.constant 0 : index
    %c0_1 = arith.constant 0 : index
    %3 = vector.load %arg2[%c0, %c0_1] : memref<8x32xf32, #tpu.memory_space<vmem>>, vector<8x32xf32>
    %c32_i32 = arith.constant 32 : i32
    %4 = arith.muli %arg1, %c32_i32 : i32
    %5 = tpu.iota {dimensions = array<i32: 1>} : vector<8x32xi32>
    %6 = vector.broadcast %4 : i32 to vector<8x32xi32>
    %7 = arith.addi %6, %5 : vector<8x32xi32>
    %c0_2 = arith.constant 0 : index
    %c0_3 = arith.constant 0 : index
    %8 = vector.load %arg3[%c0_2, %c0_3] : memref<8x1xi32, #tpu.memory_space<vmem>>, vector<8x1xi32>
    %c0_4 = arith.constant 0 : index
    %c0_5 = arith.constant 0 : index
    %9 = vector.load %arg5[%c0_4, %c0_5] : memref<8x1xf32, #tpu.memory_space<vmem>>, vector<8x1xf32>
    %cst = arith.constant dense<0xFF800000> : vector<8xf32>
    %10 = vector.multi_reduction <maximumf>, %3, %cst [1] : vector<8x32xf32> to vector<8xf32>
    %11 = vector.shape_cast %10 : vector<8xf32> to vector<8x1xf32>
    %12 = arith.maximumf %9, %11 : vector<8x1xf32>
    %13 = arith.subf %9, %12 : vector<8x1xf32>
    %14 = math.exp %13 : vector<8x1xf32>
    %15 = vector.broadcast %12 : vector<8x1xf32> to vector<8x32xf32>
    %16 = arith.subf %3, %15 : vector<8x32xf32>
    %17 = math.exp %16 : vector<8x32xf32>
    %c0_6 = arith.constant 0 : index
    %c0_7 = arith.constant 0 : index
    %18 = vector.load %arg6[%c0_6, %c0_7] : memref<8x1xf32, #tpu.memory_space<vmem>>, vector<8x1xf32>
    %19 = arith.mulf %14, %18 : vector<8x1xf32>
    %cst_8 = arith.constant dense<0.000000e+00> : vector<8xf32>
    %20 = vector.multi_reduction <add>, %17, %cst_8 [1] : vector<8x32xf32> to vector<8xf32>
    %21 = vector.shape_cast %20 : vector<8xf32> to vector<8x1xf32>
    %22 = arith.addf %19, %21 : vector<8x1xf32>
    %c0_9 = arith.constant 0 : index
    %c0_10 = arith.constant 0 : index
    %23 = vector.load %arg6[%c0_9, %c0_10] : memref<8x1xf32, #tpu.memory_space<vmem>>, vector<8x1xf32>
    tpu.vector_store %arg6[%c0_9, %c0_10], %22 {strides = array<i32>} : memref<8x1xf32, #tpu.memory_space<vmem>>, vector<8x1xf32>,
    %c0_11 = arith.constant 0 : index
    %c0_12 = arith.constant 0 : index
    %24 = vector.load %arg5[%c0_11, %c0_12] : memref<8x1xf32, #tpu.memory_space<vmem>>, vector<8x1xf32>
    tpu.vector_store %arg5[%c0_11, %c0_12], %12 {strides = array<i32>} : memref<8x1xf32, #tpu.memory_space<vmem>>, vector<8x1xf32>,
    %cst_13 = arith.constant dense<0.000000e+00> : vector<8xf32>
    %25 = vector.multi_reduction <add>, %3, %cst_13 [1] : vector<8x32xf32> to vector<8xf32>
    %26 = vector.shape_cast %25 : vector<8xf32> to vector<8x1xf32>
    %27 = vector.broadcast %8 : vector<8x1xi32> to vector<8x32xi32>
    %28 = arith.cmpi eq, %7, %27 : vector<8x32xi32>
    %cst_14 = arith.constant 0.000000e+00 : f32
    %29 = vector.broadcast %cst_14 : f32 to vector<8x32xf32>
    %30 = arith.select %28, %3, %29 : vector<8x32xi1>, vector<8x32xf32>
    %cst_15 = arith.constant dense<0.000000e+00> : vector<8xf32>
    %31 = vector.multi_reduction <add>, %30, %cst_15 [1] : vector<8x32xf32> to vector<8xf32>
    %32 = vector.shape_cast %31 : vector<8xf32> to vector<8x1xf32>
    %c0_16 = arith.constant 0 : index
    %c0_17 = arith.constant 0 : index
    %33 = vector.load %arg7[%c0_16, %c0_17] : memref<8x1xf32, #tpu.memory_space<vmem>>, vector<8x1xf32>
    %cst_18 = arith.constant 3.125000e-03 : f32
    %34 = vector.broadcast %cst_18 : f32 to vector<8x1xf32>
    %35 = arith.mulf %34, %26 : vector<8x1xf32>
    %cst_19 = arith.constant 0.899999976 : f32
    %36 = vector.broadcast %cst_19 : f32 to vector<8x1xf32>
    %37 = arith.mulf %36, %32 : vector<8x1xf32>
    %38 = arith.addf %35, %37 : vector<8x1xf32>
    %39 = arith.addf %33, %38 : vector<8x1xf32>
    %c0_20 = arith.constant 0 : index
    %c0_21 = arith.constant 0 : index
    %40 = vector.load %arg7[%c0_20, %c0_21] : memref<8x1xf32, #tpu.memory_space<vmem>>, vector<8x1xf32>
    tpu.vector_store %arg7[%c0_20, %c0_21], %39 {strides = array<i32>} : memref<8x1xf32, #tpu.memory_space<vmem>>, vector<8x1xf32>,
    %c0_i32_22 = arith.constant 0 : i32
    %41 = arith.cmpi eq, %arg1, %c0_i32_22 : i32
    %42 = arith.extui %41 : i1 to i32
    %c0_i32_23 = arith.constant 0 : i32
    %43 = arith.cmpi ne, %42, %c0_i32_23 : i32
    scf.if %43 {
      %c0_24 = arith.constant 0 : index
      %c0_25 = arith.constant 0 : index
      %44 = vector.load %arg5[%c0_24, %c0_25] : memref<8x1xf32, #tpu.memory_space<vmem>>, vector<8x1xf32>
      %c0_26 = arith.constant 0 : index
      %c0_27 = arith.constant 0 : index
      %45 = vector.load %arg6[%c0_26, %c0_27] : memref<8x1xf32, #tpu.memory_space<vmem>>, vector<8x1xf32>
      %46 = math.log %45 : vector<8x1xf32>
      %47 = arith.addf %44, %46 : vector<8x1xf32>
      %c0_28 = arith.constant 0 : index
      %c0_29 = arith.constant 0 : index
      %48 = vector.load %arg7[%c0_28, %c0_29] : memref<8x1xf32, #tpu.memory_space<vmem>>, vector<8x1xf32>
      %49 = arith.subf %47, %48 : vector<8x1xf32>
      %c8_i32 = arith.constant 8 : i32
      %50 = arith.muli %arg0, %c8_i32 : i32
      %51 = tpu.iota {dimensions = array<i32: 0>} : vector<8x1xi32>
      %52 = vector.broadcast %50 : i32 to vector<8x1xi32>
      %53 = arith.addi %52, %51 : vector<8x1xi32>
      %c8_i32_30 = arith.constant 8 : i32
      %54 = vector.broadcast %c8_i32_30 : i32 to vector<8x1xi32>
      %55 = arith.cmpi slt, %53, %54 : vector<8x1xi32>
      %cst_31 = arith.constant 0.000000e+00 : f32
      %56 = vector.broadcast %cst_31 : f32 to vector<8x1xf32>
      %57 = arith.select %55, %49, %56 : vector<8x1xi1>, vector<8x1xf32>
      %58 = vector.shape_cast %57 : vector<8x1xf32> to vector<1x8x1xf32>
      %cst_32 = arith.constant dense<0.000000e+00> : vector<1xf32>
      %59 = vector.multi_reduction <add>, %58, %cst_32 [1, 2] : vector<1x8x1xf32> to vector<1xf32>
      %60 = vector.shape_cast %59 : vector<1xf32> to vector<1x1x1xf32>
      %61 = vector.extract %60[0, 0, 0] : f32 from vector<1x1x1xf32>
      %c0_33 = arith.constant 0 : index
      %c0_34 = arith.constant 0 : index
      %62 = memref.load %arg4[%c0_33, %c0_34] : memref<1x1xf32, #tpu.memory_space<smem>>
      memref.store %61, %arg4[%c0_33, %c0_34] : memref<1x1xf32, #tpu.memory_space<smem>>
    } else {
    }
    return
  }
  func.func @transform_0(%arg0: i32, %arg1: i32) -> (i32, i32) {
    %c0_i32 = arith.constant 0 : i32
    return %arg0, %arg1 : i32, i32
  }
  func.func @transform_1(%arg0: i32, %arg1: i32) -> (i32, i32) {
    %c0_i32 = arith.constant 0 : i32
    %c0_i32_0 = arith.constant 0 : i32
    return %arg0, %c0_i32 : i32, i32
  }
  func.func @transform_2(%arg0: i32, %arg1: i32) -> (i32, i32) {
    %c0_i32 = arith.constant 0 : i32
    %c0_i32_0 = arith.constant 0 : i32
    return %arg0, %c0_i32 : i32, i32
  }
}

</mosaic_0001>

<bundles_post_ra>
// kernel: tpu_custom_call.1
= control target key start
LH: loop header
LB: loop body
LE: loop exit
PB: predicated region body
PF: predicated region fallthrough
CT: control target
= control target key end

     0   :  { %7 = vsyncpa [#allocation6], 0  ;;  %s282_s0 = inlined_call_operand.hbm [shape: f32[8,32], index: 0, kind: input, shape index: {}]   ;;  %s283_s1 = inlined_call_operand.hbm [shape: s32[8,1], index: 1, kind: input, shape index: {}]   ;;  %s284_s2 = inlined_call_operand.hbm [shape: f32[1,1], index: 2, kind: output, shape index: {}]  }
   0x1   :  { %8 = vsyncpa [#allocation9], 0 }
   0x2   :  { %9 = vsyncpa [#allocation7], 0  ;;  %s214_s9 = smov [#allocation5]   ;;  %s215_s11 = smov [#allocation8]  }
   0x3   :  { %s16_s10 = sshll.u32 %s214_s9, 4  ;;  %s26_s12 = sshll.u32 %s215_s11, 4  ;;  %s17_s10 = int_to_ptr.vmem [resolvable:$true] %s16_s10  ;;  %s27_s12 = int_to_ptr.vmem [resolvable:$true] %s26_s12 }
   0x4   :  { %s154_s15 = scalar_lea.hbm %s282_s0, 128 }
   0x5   :  { %p155_p0 = scmp.ne.s32.totalorder %s282_s0, %s154_s15  ;;  %p158_p1 = scmp.lt.u32.totalorder %s154_s15, %s282_s0 }
   0x7   :  { %p160_p2 = pnand %p158_p1, %p155_p0 }
   0x9   :  { %163 = shalt.err (!%p160_p2)
}
   0xa   :  { %s164_s20 = scalar_lea.vmem %s17_s10, 128  ;;  %p169_p4 = scmp.lt.s32.totalorder %s17_s10, %s17_s10 }
   0xb   :  { %p165_p3 = scmp.ne.s32.totalorder %s17_s10, %s164_s20  ;;  %p170_p5 = scmp.lt.s32.totalorder %s164_s20, %s164_s20 }
   0xd   :  { %p171_p6 = por %p170_p5, %p169_p4 }
   0xf   :  { %p172_p7 = pnand %p171_p6, %p165_p3 }
  0x11   :  { %175 = shalt.err (!%p172_p7)
}
  0x12   :  { %19 = dma.hbm_to_vmem [thread:$0]  %s282_s0, 128, %s17_s10, [#allocation6]  }
  0x13   :  { %s176_s25 = scalar_lea.hbm %s283_s1, 128 }
  0x14   :  { %p177_p8 = scmp.ne.s32.totalorder %s283_s1, %s176_s25  ;;  %p180_p9 = scmp.lt.u32.totalorder %s176_s25, %s283_s1 }
  0x16   :  { %p182_p10 = pnand %p180_p9, %p177_p8 }
  0x18   :  { %185 = shalt.err (!%p182_p10)
}
  0x19   :  { %s186_s30 = scalar_lea.vmem %s27_s12, 128  ;;  %p191_p12 = scmp.lt.s32.totalorder %s27_s12, %s27_s12 }
  0x1a   :  { %p187_p11 = scmp.ne.s32.totalorder %s27_s12, %s186_s30  ;;  %p192_p13 = scmp.lt.s32.totalorder %s186_s30, %s186_s30 }
  0x1c   :  { %p193_p0 = por %p192_p13, %p191_p12 }
  0x1e   :  { %p194_p1 = pnand %p193_p0, %p187_p11 }
  0x20   :  { %197 = shalt.err (!%p194_p1)
}
  0x21   :  { %29 = dma.hbm_to_vmem [thread:$0]  %s283_s1, 128, %s27_s12, [#allocation9]  }
  0x22   :  { %208 = dma.done.wait [#allocation6], 128  }
  0x23   :  { %209 = vsyncadd [#allocation6], 4294967168 }
  0x24   :  { %210 = dma.done.wait [#allocation9], 128  }
  0x25   :  { %211 = vsyncadd [#allocation9], 4294967168  ;;  %vm40_vm0 = vcmask 7168   ;;  %v216_v0 = vmov -1e+30   ;;  %vm52_vm1 = vcmask 261120   ;;  %v46_v13 = vlaneseq }
  0x26   :  { %41 = vst.msk [vmem:[#allocation2] sm:$0xff] %vm40_vm0, %v216_v0  ;;  %v44_v1 = vld [vmem:[#allocation5] sm:$0xff]  ;;  %v217_v3 = vmov 0   ;;  %v50_v4 = vld [vmem:[#allocation8] sm:$0xff]  ;;  %v218_v5 = vmov 0.0   ;;  %s198_s6 = scalar_lea.hbm %s284_s2, 16 }
  0x27   :  { %v53_v2 = vsel %vm52_vm1, %v44_v1, -inf  ;;  %146 = vset.pattern.permute.xlu0 %v217_v3  ;;  %147 = vset.pattern.permute.xlu1 %v217_v3  ;;  %42 = vst.msk [vmem:[#allocation3] sm:$0xff] %vm40_vm0, %v218_v5  ;;  %43 = vst.msk [vmem:[#allocation4] sm:$0xff] %vm40_vm0, %v218_v5  ;;  %v47_v14 = vand.u32 127, %v46_v13  ;;  %v77_v18 = vsel %vm52_vm1, %v44_v1, 0.0  ;;  %p199_p2 = scmp.ne.s32.totalorder %s284_s2, %s198_s6  ;;  %p202_p3 = scmp.lt.u32.totalorder %s198_s6, %s284_s2 }
  0x28   :  { %54 = vmax.xlane.f32.xlu0 %v53_v2  ;;  %81 = vperm.xlu1 %147, %v50_v4  }
  0x29   :  { %p204_p4 = pnand %p202_p3, %p199_p2 }
  0x2d   :  { %v51_v6 = vld [vmem:[#allocation2] sm:$0xff] }
  0x2e   :  { %v68_v23 = vld [vmem:[#allocation3] sm:$0xff]  ;;  %v88_v31 = vld [vmem:[#allocation4] sm:$0xff] }
  0xa7   :  { %v82_v15 = vpop.permute.xlu1 %81 }
  0xa8   :  { %vm83_vm2 = vcmp.eq.s32.totalorder %v47_v14, %v82_v15 }
  0xa9   :  { %v84_v19 = vsel %vm83_vm2, %v44_v1, 0.0 }
  0xaa   :  { %v85_v20 = vsel %vm52_vm1, %v84_v19, 0.0 }
  0xb5   :  { %v55_v7 = vpop.xlane.xlu0 %54 }
  0xb6   :  { %v56_v8 = vmax.f32 %v51_v6, %v55_v7 }
  0xb8   :  { %v57_v9 = vsub.f32 %v51_v6, %v56_v8  ;;  %76 = vst.msk [vmem:[#allocation2] sm:$0xff] %vm40_vm0, %v56_v8  ;;  %62 = vperm.xlu0 %146, %v56_v8  }
  0xba   :  { %v58_v21 = vmul.f32 1.442695, %v57_v9 }
  0xbf   :  { %v97_v37 = vld [vmem:[#allocation2] sm:$0xff] }
 0x137   :  { %v63_v10 = vpop.permute.xlu0 %62 }
 0x138   :  { %v65_v11 = vsub.f32 %v44_v1, %v63_v10 }
 0x13a   :  { %v66_v12 = vmul.f32 1.442695, %v65_v11 }
 0x13c   :  { %148 = vpow2.f32 %v66_v12 }
 0x13d   :  { %150 = vpow2.f32 %v58_v21 }
 0x146   :  { %v149_v16 = vpop.eup %148 }
 0x147   :  { %v70_v17 = vsel %vm52_vm1, %v149_v16, 0.0  ;;  %v151_v22 = vpop.eup %150 }
 0x148   :  { %71 = vadd.xlane.f32.xlu1 %v70_v17  ;;  %v69_v24 = vmul.f32 %v151_v22, %v68_v23 }
 0x14c   :  { %78 = vadd.xlane.f32.xlu1 %v77_v18 }
 0x150   :  { %86 = vadd.xlane.f32.xlu1 %v85_v20 }
 0x1d5   :  { %v72_v25 = vpop.xlane.xlu1 %71 }
 0x1d6   :  { %v73_v26 = vadd.f32 %v72_v25, %v69_v24 }
 0x1d8   :  { %75 = vst.msk [vmem:[#allocation3] sm:$0xff] %vm40_vm0, %v73_v26 }
 0x1d9   :  { %v79_v27 = vpop.xlane.xlu1 %78 }
 0x1da   :  { %v89_v28 = vmul.f32 0.003125, %v79_v27 }
 0x1dd   :  { %v87_v29 = vpop.xlane.xlu1 %86 }
 0x1de   :  { %v90_v30 = vmul.f32 0.9, %v87_v29 }
 0x1df   :  { %v98_v32 = vld [vmem:[#allocation3] sm:$0xff] }
 0x1e0   :  { %v91_v33 = vadd.f32 %v90_v30, %v89_v28  ;;  %152 = vlog2.f32 %v98_v32 }
 0x1e2   :  { %v92_v34 = vadd.f32 %v91_v33, %v88_v31 }
 0x1e4   :  { %93 = vst.msk [vmem:[#allocation4] sm:$0xff] %vm40_vm0, %v92_v34 }
 0x1ea   :  { %v153_v35 = vpop.eup %152 }
 0x1eb   :  { %v100_v36 = vmul.f32 0.6931472, %v153_v35  ;;  %v102_v39 = vld [vmem:[#allocation4] sm:$0xff] }
 0x1ed   :  { %v101_v38 = vadd.f32 %v100_v36, %v97_v37 }
 0x1ef   :  { %v103_v40 = vsub.f32 %v101_v38, %v102_v39 }
 0x1f1   :  { %v111_v41 = vsel %vm40_vm0, %v103_v40, 0.0 }
 0x1f2   :  { %112 = vadd.xlane.f32.xlu0 %v111_v41 }
 0x27f   :  { %v113_v42 = vpop.xlane.xlu0 %112 }
 0x280   :  { %v114_v43 = vrot.slane %v113_v42, 4 }
 0x282   :  { %v115_v44 = vadd.f32 %v114_v43, %v113_v42 }
 0x284   :  { %v116_v45 = vrot.slane %v115_v44, 2 }
 0x286   :  { %v117_v46 = vadd.f32 %v116_v45, %v115_v44 }
 0x288   :  { %v118_v47 = vrot.slane %v117_v46, 1 }
 0x28a   :  { %v119_v48 = vadd.f32 %v118_v47, %v117_v46 }
 0x28c   :  { %138 = vpush %v119_v48 }
 0x2bd   :  { %s139_s1 = spop %138 }
 0x2be   :  { %122 = sst [smem:[#allocation10]] %s139_s1 }
 0x2bf   :  { %207 = shalt.err (!%p204_p4)
}
 0x2c0   :  { %s219_s11 = smov [#allocation10]  }
 0x2c1   :  { %130 = dma.smem_to_hbm %s219_s11, 16, %s284_s2, [#allocation7]  }
 0x2c2   :  { %212 = dma.done.wait [#allocation7], 16  }
 0x2c3   :  { %213 = vsyncadd [#allocation7], 4294967280 }
 0x2c4   :  { %134 = sfence }
 0x2c5   :  { %135 = vsyncpa [#allocation6], 1 }
 0x2c6   :  { %136 = vsyncpa [#allocation9], 1 }
 0x2c7   :  { %137 = vsyncpa [#allocation7], 1 }

</bundles_post_ra>
